<compile_context>
chip_gen: v7x
topology: tpu7x:2x2x1
jax: 0.10.0
libtpu: 0.0.40
codegen_flags: <defaults>
</compile_context>

<pallas_src>
import functools

import jax
import jax.numpy as jnp
from jax.experimental import pallas as pl
from jax.experimental.pallas import tpu as pltpu


def _round_up(x, m):
    return (x + m - 1) // m * m


# ---------------------------------------------------------------------------
# Pallas kernel: fused classification head
#   out = relu(pooler @ W1 + b1) @ W2 + b2      (dropout = identity, eval mode)
# bf16 operands -> f32 MXU accumulation; E contraction processed in column
# chunks so the f32 intermediate never materializes at full (B_tile, E_pad).
# ---------------------------------------------------------------------------
def _classifier_head_kernel(x_ref, w1_ref, b1_ref, w2_ref, b2_ref, out_ref, *,
                            chunk):
    x = x_ref[...]                                        # (B_tile, E_pad) bf16
    e_pad = w1_ref.shape[1]
    acc = jnp.zeros(out_ref.shape, jnp.float32)           # (B_tile, L_pad) f32

    for c0 in range(0, e_pad, chunk):                     # static trace-time loop
        # pre_classifier column chunk: bf16 x bf16 -> f32 on the MXU.
        h = jnp.dot(x, w1_ref[:, c0:c0 + chunk],
                    preferred_element_type=jnp.float32)
        h = jnp.maximum(h + b1_ref[:, c0:c0 + chunk], 0.0)   # bias + ReLU (f32 VPU)
        # Dropout: nn.Dropout is identity in eval mode.
        # classifier partial product over the same columns.  ReLU is
        # elementwise per column, so splitting the K contraction is exact.
        acc = acc + jnp.dot(h.astype(jnp.bfloat16), w2_ref[c0:c0 + chunk, :],
                            preferred_element_type=jnp.float32)

    out_ref[...] = (acc + b2_ref[...]).astype(out_ref.dtype)


# ---------------------------------------------------------------------------
# One-time weight preparation (call at init, NOT inside the per-call path).
# ---------------------------------------------------------------------------
def prepare_classifier_head_params(w1, b1, w2, b2):
    """Pad E/L to lane-dense multiples of 128 and cast matmul operands to bf16.

    Biases stay f32 for the epilogue.  Zero padding is exact: zero rows/cols
    contribute nothing through Linear + ReLU.  Weights are stored (in, out):
    y = x @ W + b  (== PyTorch x @ W_pt.T + b).
    """
    e, l = w1.shape[0], w2.shape[1]
    e_pad, l_pad = _round_up(e, 128), _round_up(l, 128)
    return {
        "w1": jnp.pad(w1, ((0, e_pad - e), (0, e_pad - e))).astype(jnp.bfloat16),
        "b1": jnp.pad(b1, (0, e_pad - e)).astype(jnp.float32).reshape(1, e_pad),
        "w2": jnp.pad(w2, ((0, e_pad - e), (0, l_pad - l))).astype(jnp.bfloat16),
        "b2": jnp.pad(b2, (0, l_pad - l)).astype(jnp.float32).reshape(1, l_pad),
        "emb_size": e,
        "num_labels": l,
    }


def _pick_batch_tile(batch):
    # Multiples of 16 (bf16 sublane packing).  For moderate/large batches aim
    # for >=2 grid steps so ("parallel",) can shard the batch across v7x's two
    # TensorCores; cap at 256 to stay inside v7x's 32 MiB scoped-VMEM default.
    # TODO(synk): per-generation tuning -- up to 512 on v6e, 128 on v5e.
    if batch <= 16:
        return _round_up(batch, 16)
    return min(256, _round_up(pl.cdiv(batch, 2), 16))


def classifier_head(hidden_state, head, *, out_dtype=jnp.float32):
    """hidden_state: (B, S, E) from the backbone; head: prepared param dict.

    Returns logits (B, num_labels).
    """
    batch = hidden_state.shape[0]
    e, l = head["emb_size"], head["num_labels"]
    e_pad = head["w1"].shape[0]
    l_pad = head["w2"].shape[1]

    b_tile = _pick_batch_tile(batch)
    b_pad = _round_up(batch, b_tile)
    grid = (b_pad // b_tile,)

    # CLS slice + (small) pad + bf16 cast: one fused XLA producer over a
    # (B, E) slab only; the full (B, S, E) hidden_state is never copied.
    pooler = hidden_state[:, 0]
    pooler = jnp.pad(pooler, ((0, b_pad - batch), (0, e_pad - e)))
    pooler = pooler.astype(jnp.bfloat16)

    # Contraction chunk: keeps the f32 intermediate in vregs (v5e-friendly);
    # harmless on v6e/v7x.
    chunk = 256 if e_pad % 256 == 0 else 128
    kernel = functools.partial(_classifier_head_kernel, chunk=chunk)

    # Advisory cost so XLA can overlap this custom call with its neighbors.
    cost = pl.CostEstimate(
        flops=2 * b_pad * e_pad * (e_pad + l_pad),
        transcendentals=0,
        bytes_accessed=(b_pad * e_pad * 2                    # activations (bf16)
                        + e_pad * (e_pad + l_pad) * 2        # weights (bf16)
                        + (e_pad + l_pad) * 4                # biases (f32)
                        + b_pad * l_pad * jnp.dtype(out_dtype).itemsize),
    )

    out_padded = pl.pallas_call(
        kernel,
        out_shape=jax.ShapeDtypeStruct((b_pad, l_pad), out_dtype),
        grid=grid,
        in_specs=[
            # Streaming activation tile over the batch grid.
            pl.BlockSpec((b_tile, e_pad), lambda i: (i, 0)),
            # Weights / biases: constant index_map -> fetched once, stay
            # VMEM-resident across all batch tiles.
            pl.BlockSpec((e_pad, e_pad), lambda i: (0, 0)),
            pl.BlockSpec((1, e_pad), lambda i: (0, 0)),
            pl.BlockSpec((e_pad, l_pad), lambda i: (0, 0)),
            pl.BlockSpec((1, l_pad), lambda i: (0, 0)),
        ],
        out_specs=pl.BlockSpec((b_tile, l_pad), lambda i: (i, 0)),
        compiler_params=pltpu.CompilerParams(
            # Batch tiles are independent -> shard across TCs (v7x megacore).
            dimension_semantics=("parallel",),
        ),
        cost_estimate=cost,
    )(pooler, head["w1"], head["b1"], head["w2"], head["b2"])

    # Padded rows hold relu(b1)@W2+b2 garbage; slice them off.  Nothing
    # downstream may read the padded region.
    # TODO(synk): emit bf16 / padded logits directly if the consumer accepts.
    return out_padded[:batch, :l]


# ---------------------------------------------------------------------------
# Glue: stand-in backbone + full forward
# ---------------------------------------------------------------------------
def backbone_stub(input_ids, attention_mask, emb_table):
    """Deterministic stand-in for the BERT backbone `self.l1`.

    Returns hidden_state of shape (B, S, E).
    TODO(synk): a real BERT encoder (multi-layer attention stack) is an
    external module passed into __init__ and is not replicated here.
    """
    hidden = emb_table[input_ids]                                   # (B, S, E)
    hidden = hidden * attention_mask[..., None].astype(hidden.dtype)
    return hidden


def bert_classificator_forward(emb_table, head, input_ids, attention_mask):
    hidden_state = backbone_stub(input_ids, attention_mask, emb_table)
    return classifier_head(hidden_state, head)


# ---------------------------------------------------------------------------
# Deterministic parameter init
# ---------------------------------------------------------------------------
def init_params(key, vocab_size, emb_size, num_labels):
    k0, k1, k2, k3, k4 = jax.random.split(key, 5)
    scale1 = 1.0 / jnp.sqrt(emb_size)
    return {
        "emb_table": jax.random.normal(k0, (vocab_size, emb_size), jnp.float32) * 0.02,
        # stored as (in, out): y = x @ W + b
        "pre_classifier_w": jax.random.uniform(k1, (emb_size, emb_size), jnp.float32,
                                               -scale1, scale1),
        "pre_classifier_b": jax.random.uniform(k2, (emb_size,), jnp.float32,
                                               -scale1, scale1),
        "classifier_w": jax.random.uniform(k3, (emb_size, num_labels), jnp.float32,
                                           -scale1, scale1),
        "classifier_b": jax.random.uniform(k4, (num_labels,), jnp.float32,
                                           -scale1, scale1),
    }


if __name__ == "__main__":
    # Small shapes consistent with the module (num_labels=13 default; E kept
    # lane-dense at 128 instead of BERT's 768 to stay small).
    B, S, E, L, V = 2, 8, 128, 13, 50

    key = jax.random.PRNGKey(0)
    kp, ki = jax.random.split(key, 2)

    params = init_params(kp, vocab_size=V, emb_size=E, num_labels=L)
    # One-time weight prep (padding + bf16 cast hoisted out of the forward).
    head = prepare_classifier_head_params(
        params["pre_classifier_w"], params["pre_classifier_b"],
        params["classifier_w"], params["classifier_b"])

    input_ids = jax.random.randint(ki, (B, S), 0, V, dtype=jnp.int32)
    attention_mask = jnp.ones((B, S), dtype=jnp.int32)

    fwd = jax.jit(functools.partial(bert_classificator_forward,
                                    params["emb_table"], head))
    out = fwd(input_ids, attention_mask)
    out = jax.block_until_ready(out)
    assert out.shape == (B, L), out.shape

    # Pure-JAX f32 reference of the head.  The kernel uses bf16 matmul
    # operands with f32 accumulation, so tolerance is loosened accordingly.
    hidden = backbone_stub(input_ids, attention_mask, params["emb_table"])
    pooler = hidden[:, 0]
    ref = jnp.maximum(pooler @ params["pre_classifier_w"] + params["pre_classifier_b"], 0.0)
    ref = ref @ params["classifier_w"] + params["classifier_b"]
    max_err = jnp.max(jnp.abs(out - ref))
    assert jnp.allclose(out, ref, atol=2e-2, rtol=2e-2), f"mismatch vs reference: {max_err}"

    print("KERNEL_OK")
</pallas_src>

<mosaic_0001>
module attributes {stable_mosaic.version = 11 : i64} {
  func.func @_classifier_head_kernel(%arg0: i32, %arg1: memref<16x128xbf16, #tpu.memory_space<vmem>>, %arg2: memref<128x128xbf16, #tpu.memory_space<vmem>>, %arg3: memref<1x128xf32, #tpu.memory_space<vmem>>, %arg4: memref<128x128xbf16, #tpu.memory_space<vmem>>, %arg5: memref<1x128xf32, #tpu.memory_space<vmem>>, %arg6: memref<16x128xf32, #tpu.memory_space<vmem>>) attributes {dimension_semantics = [#tpu.dimension_semantics<parallel>], iteration_bounds = array<i64: 1>, scalar_prefetch = 0 : i64, scratch_operands = 0 : i64, tpu.core_type = #tpu.core_type<tc>, window_params = [{transform_indices = @transform_0, window_bounds = array<i64: 16, 128>}, {pipeline_mode = #tpu.pipeline_mode<synchronous>, transform_indices = @transform_1, window_bounds = array<i64: 128, 128>}, {pipeline_mode = #tpu.pipeline_mode<synchronous>, transform_indices = @transform_2, window_bounds = array<i64: 1, 128>}, {pipeline_mode = #tpu.pipeline_mode<synchronous>, transform_indices = @transform_3, window_bounds = array<i64: 128, 128>}, {pipeline_mode = #tpu.pipeline_mode<synchronous>, transform_indices = @transform_4, window_bounds = array<i64: 1, 128>}, {transform_indices = @transform_5, window_bounds = array<i64: 16, 128>}]} {
    %c0 = arith.constant 0 : index
    %c0_0 = arith.constant 0 : index
    %0 = vector.load %arg1[%c0, %c0_0] : memref<16x128xbf16, #tpu.memory_space<vmem>>, vector<16x128xbf16>
    %cst = arith.constant 0.000000e+00 : f32
    %1 = vector.broadcast %cst : f32 to vector<16x128xf32>
    %c0_1 = arith.constant 0 : index
    %c0_2 = arith.constant 0 : index
    %2 = vector.load %arg2[%c0_1, %c0_2] : memref<128x128xbf16, #tpu.memory_space<vmem>>, vector<128x128xbf16>
    %cst_3 = arith.constant dense<0.000000e+00> : vector<16x128xf32>
    %3 = tpu.matmul %0, %2, %cst_3 {dimension_numbers = #tpu.dot_dimension_numbers<[1], [0], [0], [1], [0, 0, 1, 1], [], []>} : vector<16x128xbf16>, vector<128x128xbf16>, vector<16x128xf32> -> vector<16x128xf32>
    %c0_4 = arith.constant 0 : index
    %c0_5 = arith.constant 0 : index
    %4 = vector.load %arg3[%c0_4, %c0_5] : memref<1x128xf32, #tpu.memory_space<vmem>>, vector<1x128xf32>
    %5 = vector.broadcast %4 : vector<1x128xf32> to vector<16x128xf32>
    %6 = arith.addf %3, %5 : vector<16x128xf32>
    %cst_6 = arith.constant 0.000000e+00 : f32
    %7 = vector.broadcast %cst_6 : f32 to vector<16x128xf32>
    %8 = arith.maximumf %6, %7 : vector<16x128xf32>
    %9 = arith.truncf %8 : vector<16x128xf32> to vector<16x128xbf16>
    %c0_7 = arith.constant 0 : index
    %c0_8 = arith.constant 0 : index
    %10 = vector.load %arg4[%c0_7, %c0_8] : memref<128x128xbf16, #tpu.memory_space<vmem>>, vector<128x128xbf16>
    %cst_9 = arith.constant dense<0.000000e+00> : vector<16x128xf32>
    %11 = tpu.matmul %9, %10, %cst_9 {dimension_numbers = #tpu.dot_dimension_numbers<[1], [0], [0], [1], [0, 0, 1, 1], [], []>} : vector<16x128xbf16>, vector<128x128xbf16>, vector<16x128xf32> -> vector<16x128xf32>
    %12 = arith.addf %1, %11 : vector<16x128xf32>
    %c0_10 = arith.constant 0 : index
    %c0_11 = arith.constant 0 : index
    %13 = vector.load %arg5[%c0_10, %c0_11] : memref<1x128xf32, #tpu.memory_space<vmem>>, vector<1x128xf32>
    %14 = vector.broadcast %13 : vector<1x128xf32> to vector<16x128xf32>
    %15 = arith.addf %12, %14 : vector<16x128xf32>
    %c0_12 = arith.constant 0 : index
    %c0_13 = arith.constant 0 : index
    %16 = vector.load %arg6[%c0_12, %c0_13] : memref<16x128xf32, #tpu.memory_space<vmem>>, vector<16x128xf32>
    tpu.vector_store %arg6[%c0_12, %c0_13], %15 {strides = array<i32>} : memref<16x128xf32, #tpu.memory_space<vmem>>, vector<16x128xf32>,
    return
  }
  func.func @transform_0(%arg0: i32) -> (i32, i32) {
    %c0_i32 = arith.constant 0 : i32
    %c0_i32_0 = arith.constant 0 : i32
    return %arg0, %c0_i32 : i32, i32
  }
  func.func @transform_1(%arg0: i32) -> (i32, i32) {
    %c0_i32 = arith.constant 0 : i32
    %c0_i32_0 = arith.constant 0 : i32
    %c0_i32_1 = arith.constant 0 : i32
    return %c0_i32, %c0_i32_0 : i32, i32
  }
  func.func @transform_2(%arg0: i32) -> (i32, i32) {
    %c0_i32 = arith.constant 0 : i32
    %c0_i32_0 = arith.constant 0 : i32
    %c0_i32_1 = arith.constant 0 : i32
    return %c0_i32, %c0_i32_0 : i32, i32
  }
  func.func @transform_3(%arg0: i32) -> (i32, i32) {
    %c0_i32 = arith.constant 0 : i32
    %c0_i32_0 = arith.constant 0 : i32
    %c0_i32_1 = arith.constant 0 : i32
    return %c0_i32, %c0_i32_0 : i32, i32
  }
  func.func @transform_4(%arg0: i32) -> (i32, i32) {
    %c0_i32 = arith.constant 0 : i32
    %c0_i32_0 = arith.constant 0 : i32
    %c0_i32_1 = arith.constant 0 : i32
    return %c0_i32, %c0_i32_0 : i32, i32
  }
  func.func @transform_5(%arg0: i32) -> (i32, i32) {
    %c0_i32 = arith.constant 0 : i32
    %c0_i32_0 = arith.constant 0 : i32
    return %arg0, %c0_i32 : i32, i32
  }
}

</mosaic_0001>

<bundles_post_ra>
// kernel: bert_classificator_forward.1
= control target key start
LH: loop header
LB: loop body
LE: loop exit
PB: predicated region body
PF: predicated region fallthrough
CT: control target
= control target key end

     0   :  { %v358_v0 = vmov 0.0   ;;  %vm359_vm0 = vmmov 0   ;;  %s453_s1 = inlined_call_operand.vmem [shape: bf16[128,128], index: 1, kind: input, shape index: {}]   ;;  %s454_s3 = inlined_call_operand.vmem [shape: bf16[128,128], index: 3, kind: input, shape index: {}]   ;;  %s455_s0 = inlined_call_operand.vmem [shape: bf16[16,128], index: 0, kind: input, shape index: {}]   ;;  %s456_s2 = inlined_call_operand.vmem [shape: f32[1,128], index: 2, kind: input, shape index: {}]   ;;  %s457_s4 = inlined_call_operand.vmem [shape: f32[1,128], index: 4, kind: input, shape index: {}]   ;;  %s458_s5 = inlined_call_operand.vmem [shape: f32[16,128], index: 5, kind: output, shape index: {}]  }
   0x1   :  { %299 = vmatprep.subr.bf16.mxu0 %v358_v0  ;;  %v341_v1 = vld [vmem:[%s453_s1] sm:$0xff]   ;;  %315 = vmatprep.mubr.msk.bf16.mxu0 %vm359_vm0, %v358_v0  ;;  %v342_v2 = vld [vmem:[%s453_s1 + $0x8] sm:$0xff]   ;;  %v343_v3 = vld [vmem:[%s453_s1 + $0x10] sm:$0xff]  }
   0x2   :  { %319 = vmatprep.subr.bf16.mxu1 %v358_v0  ;;  %335 = vmatprep.mubr.msk.bf16.mxu1 %vm359_vm0, %v358_v0  ;;  %v350_v4 = vld [vmem:[%s454_s3] sm:$0xff]   ;;  %v344_v5 = vld [vmem:[%s453_s1 + $0x18] sm:$0xff]   ;;  %v351_v6 = vld [vmem:[%s454_s3 + $0x8] sm:$0xff]  }
   0x3   :  { %300 = vmatpush3.bf16.msra.mxu0 %v341_v1  ;;  %320 = vmatpush3.bf16.msra.mxu1 %v350_v4  ;;  %v345_v7 = vld [vmem:[%s453_s1 + $0x20] sm:$0xff]   ;;  %v352_v8 = vld [vmem:[%s454_s3 + $0x10] sm:$0xff]   ;;  %v346_v9 = vld [vmem:[%s453_s1 + $0x28] sm:$0xff]  }
   0x4   :  { %301 = vmatprep.subr.bf16.mxu0 %v358_v0  ;;  %321 = vmatprep.subr.bf16.mxu1 %v358_v0  ;;  %v353_v10 = vld [vmem:[%s454_s3 + $0x18] sm:$0xff]   ;;  %v347_v11 = vld [vmem:[%s453_s1 + $0x30] sm:$0xff]   ;;  %v354_v12 = vld [vmem:[%s454_s3 + $0x20] sm:$0xff]  }
   0x5   :  { %v348_v13 = vld [vmem:[%s453_s1 + $0x38] sm:$0xff]   ;;  %v355_v14 = vld [vmem:[%s454_s3 + $0x28] sm:$0xff]   ;;  %v349_v15 = vld [vmem:[%s455_s0] sm:$0xff]  }
   0x6   :  { %v356_v16 = vld [vmem:[%s454_s3 + $0x30] sm:$0xff]   ;;  %v357_v17 = vld [vmem:[%s454_s3 + $0x38] sm:$0xff]   ;;  %v262_v18 = vld [vmem:[%s456_s2] ss:$0 sm:$0xff] }
   0x7   :  { %302 = vmatpush3.bf16.msra.mxu0 %v342_v2  ;;  %322 = vmatpush3.bf16.msra.mxu1 %v351_v6  ;;  %v272_v28 = vld [vmem:[%s457_s4] ss:$0 sm:$0xff] }
   0x8   :  { %303 = vmatprep.subr.bf16.mxu0 %v358_v0  ;;  %323 = vmatprep.subr.bf16.mxu1 %v358_v0 }
   0xb   :  { %304 = vmatpush3.bf16.msra.mxu0 %v343_v3  ;;  %324 = vmatpush3.bf16.msra.mxu1 %v352_v8 }
   0xc   :  { %305 = vmatprep.subr.bf16.mxu0 %v358_v0  ;;  %325 = vmatprep.subr.bf16.mxu1 %v358_v0 }
   0xf   :  { %306 = vmatpush3.bf16.msra.mxu0 %v344_v5  ;;  %326 = vmatpush3.bf16.msra.mxu1 %v353_v10 }
  0x10   :  { %307 = vmatprep.subr.bf16.mxu0 %v358_v0  ;;  %327 = vmatprep.subr.bf16.mxu1 %v358_v0 }
  0x13   :  { %308 = vmatpush3.bf16.msra.mxu0 %v345_v7  ;;  %328 = vmatpush3.bf16.msra.mxu1 %v354_v12 }
  0x14   :  { %309 = vmatprep.subr.bf16.mxu0 %v358_v0  ;;  %329 = vmatprep.subr.bf16.mxu1 %v358_v0 }
  0x17   :  { %310 = vmatpush3.bf16.msra.mxu0 %v346_v9  ;;  %330 = vmatpush3.bf16.msra.mxu1 %v355_v14 }
  0x18   :  { %311 = vmatprep.subr.bf16.mxu0 %v358_v0  ;;  %331 = vmatprep.subr.bf16.mxu1 %v358_v0 }
  0x1b   :  { %312 = vmatpush3.bf16.msra.mxu0 %v347_v11  ;;  %332 = vmatpush3.bf16.msra.mxu1 %v356_v16 }
  0x1c   :  { %313 = vmatprep.subr.bf16.mxu0 %v358_v0  ;;  %333 = vmatprep.subr.bf16.mxu1 %v358_v0 }
  0x1f   :  { %314 = vmatpush3.bf16.msra.mxu0 %v348_v13  ;;  %334 = vmatpush3.bf16.msra.mxu1 %v357_v17 }
  0x22   :  { %316 = vmatmul.mubr.bf16.vlgmr.msra.gmra.mrb[0].mxu0 %v349_v15 }
  0xf5   :  { %v134_v19 = vpop.f32.mrb[0].mxu0 }
  0xf6   :  { %v135_v20 = vadd.f32 %v262_v18, %v134_v19  ;;  %v317_v21 = vpop.f32.mrb[1].mxu0 }
  0xf7   :  { %v137_v22 = vpop.f32.mrb[2].mxu0 }
  0xf8   :  { %v138_v23 = vadd.f32 %v262_v18, %v137_v22  ;;  %v318_v24 = vpop.f32.mrb[3].mxu0  ;;  %v141_v25 = vmax.f32 %v135_v20, 0.0 }
  0xfa   :  { %v142_v26 = vmax.f32 %v138_v23, 0.0 }
  0xfc   :  { %v143_v27 = vpack.c.bf16 %v142_v26, %v141_v25 }
  0xfe   :  { %336 = vmatmul.mubr.bf16.vlgmr.msra.gmra.mrb[0].mxu1 %v143_v27 }
 0x1d1   :  { %v249_v29 = vpop.f32.mrb[0].mxu1 }
 0x1d2   :  { %v250_v30 = vadd.f32 %v272_v28, %v249_v29  ;;  %v337_v31 = vpop.f32.mrb[1].mxu1 }
 0x1d3   :  { %v252_v32 = vpop.f32.mrb[2].mxu1 }
 0x1d4   :  { %256 = vst [vmem:[%s458_s5] sm:$0xff] %v250_v30  ;;  %v253_v33 = vadd.f32 %v272_v28, %v252_v32  ;;  %v338_v34 = vpop.f32.mrb[3].mxu1 }
 0x1d6   :  { %257 = vst [vmem:[%s458_s5 + $0x8] sm:$0xff] %v253_v33 }

</bundles_post_ra>
